<compile_context>
chip_gen: v5e
topology: v5e:2x2
jax: 0.10.0
libtpu: 0.0.40
codegen_flags: <defaults>
</compile_context>

<pallas_src>
import math

import jax
import jax.numpy as jnp
from jax.experimental import pallas as pl
from jax.experimental.pallas import tpu as pltpu


# ---------------- pe buffer (mirrors register_buffer, built once) ----------------
def make_pe_table(d_model: int, max_len: int = 5000, dtype=jnp.float32) -> jnp.ndarray:
    """(max_len, d_model) sin/cos table == PyTorch's `pe` squeezed of its batch dim."""
    position = jnp.arange(max_len, dtype=jnp.float32)[:, None]
    div_term = jnp.exp(jnp.arange(0, d_model, 2, dtype=jnp.float32)
                       * (-math.log(10000.0) / d_model))
    ang = position * div_term                        # (max_len, d_model//2)
    pe = jnp.zeros((max_len, d_model), jnp.float32)
    pe = pe.at[:, 0::2].set(jnp.sin(ang))
    pe = pe.at[:, 1::2].set(jnp.cos(ang))
    return pe.astype(dtype)


def make_pe_buffer_tiled(d_model: int, batch: int, max_len: int = 5000,
                         dtype=jnp.float32) -> jnp.ndarray:
    """(max_len, batch*d_model): pe replicated over the batch so an (S, B, D) input
    flattened to (S, B*D) can be updated with a plain lane-dense 2-D add.
    Column b*D + d holds pe[:, d], matching the row-major reshape of x."""
    pe = make_pe_table(d_model, max_len, dtype)      # (max_len, D)
    return jnp.tile(pe, (1, batch))                  # (max_len, B*D)


# ---------------- Pallas kernel ---------------------------------------------------
def pe_add_kernel(x_ref, pe_ref, o_ref):
    # (block_s, B*D) tiles; pe is pre-tiled across the batch, so this is a pure VPU
    # add with a lane-dense, unmasked store.
    o_ref[...] = (x_ref[...] + pe_ref[...]).astype(o_ref.dtype)
    # TODO(synk): training-mode dropout (p=0.1) would use pltpu.prng_seed /
    # pltpu.prng_random_bits here; eval mode is identity so it is omitted.


def _pick_block_s(S: int, row_bytes: int) -> int:
    """VMEM-budgeted rows per block, multiple of 8; >=2 grid steps for long S."""
    vmem_budget = 12 * 1024 * 1024                   # x, pe, out double-buffered ~ 6 blocks
    max_rows = max(8, (vmem_budget // (6 * max(row_bytes, 1))) // 8 * 8)
    s_pad = ((S + 7) // 8) * 8                       # ragged tail handled by Pallas masking
    block_s = min(max_rows, s_pad, 1024)
    if s_pad >= 512:                                 # keep >=2 grid steps (v7x dual TC)
        block_s = min(block_s, (s_pad // 2 + 7) // 8 * 8)
    return max(block_s, 8)


def positional_encoding_forward(x: jnp.ndarray, pe_tiled: jnp.ndarray) -> jnp.ndarray:
    """x: (S, B, D) seq-first input; pe_tiled: (max_len, B*D) pre-tiled buffer.
    Returns x + pe[:S] (dropout = identity / eval mode)."""
    S, B, D = x.shape
    BD = B * D
    assert pe_tiled.shape[0] >= S and pe_tiled.shape[1] == BD

    x2 = x.reshape(S, BD)                            # lane-dense view of the input
    if pe_tiled.dtype != x.dtype:
        pe_tiled = pe_tiled.astype(x.dtype)

    row_bytes = BD * jnp.dtype(x.dtype).itemsize
    block_s = _pick_block_s(S, row_bytes)
    grid = (pl.cdiv(S, block_s),)

    out2 = pl.pallas_call(
        pe_add_kernel,
        out_shape=jax.ShapeDtypeStruct((S, BD), x.dtype),
        grid=grid,
        in_specs=[
            pl.BlockSpec((block_s, BD), lambda i: (i, 0)),   # x tile
            pl.BlockSpec((block_s, BD), lambda i: (i, 0)),   # matching pe rows (no pe[:S] slice)
        ],
        out_specs=pl.BlockSpec((block_s, BD), lambda i: (i, 0)),
        compiler_params=pltpu.CompilerParams(
            dimension_semantics=("parallel",),               # seq tiles are independent
            vmem_limit_bytes=32 * 1024 * 1024,               # safe on v5e/v6e/v7x
        ),
    )(x2, pe_tiled)
    return out2.reshape(S, B, D)


# ---------------- main -------------------------------------------------------------
if __name__ == "__main__":
    D_MODEL = 64            # d_model used by IMU_Transformer
    SEQ_LEN = 26            # window_size (25) + start token
    BATCH = 2
    MAX_LEN = 5000          # PositionalEncoding default

    key = jax.random.PRNGKey(0)
    x = jax.random.normal(key, (SEQ_LEN, BATCH, D_MODEL), jnp.float32)

    # Built once at "module init" time (mirrors register_buffer + batch pre-tiling).
    pe_tiled = make_pe_buffer_tiled(D_MODEL, BATCH, MAX_LEN, x.dtype)

    fwd = jax.jit(positional_encoding_forward)
    out = jax.block_until_ready(fwd(x, pe_tiled))
    assert out.shape == (SEQ_LEN, BATCH, D_MODEL)

    # Correctness vs the exact PyTorch semantics (pe broadcast over batch, dropout=identity).
    pe_ref = make_pe_table(D_MODEL, MAX_LEN)[:SEQ_LEN, None, :]   # (S, 1, D)
    ref = x + pe_ref
    assert jnp.allclose(out, ref, atol=1e-6, rtol=1e-6)

    print("KERNEL_OK")
</pallas_src>

<mosaic_0001>
module attributes {stable_mosaic.version = 11 : i64} {
  func.func @pe_add_kernel(%arg0: i32, %arg1: memref<32x128xf32, #tpu.memory_space<vmem>>, %arg2: memref<32x128xf32, #tpu.memory_space<vmem>>, %arg3: memref<32x128xf32, #tpu.memory_space<vmem>>) attributes {dimension_semantics = [#tpu.dimension_semantics<parallel>], iteration_bounds = array<i64: 1>, scalar_prefetch = 0 : i64, scratch_operands = 0 : i64, tpu.core_type = #tpu.core_type<tc>, window_params = [{transform_indices = @transform_0, window_bounds = array<i64: 32, 128>}, {transform_indices = @transform_1, window_bounds = array<i64: 32, 128>}, {transform_indices = @transform_2, window_bounds = array<i64: 32, 128>}]} {
    %c0 = arith.constant 0 : index
    %c0_0 = arith.constant 0 : index
    %0 = vector.load %arg1[%c0, %c0_0] : memref<32x128xf32, #tpu.memory_space<vmem>>, vector<32x128xf32>
    %c0_1 = arith.constant 0 : index
    %c0_2 = arith.constant 0 : index
    %1 = vector.load %arg2[%c0_1, %c0_2] : memref<32x128xf32, #tpu.memory_space<vmem>>, vector<32x128xf32>
    %2 = arith.addf %0, %1 : vector<32x128xf32>
    %c0_3 = arith.constant 0 : index
    %c0_4 = arith.constant 0 : index
    %3 = vector.load %arg3[%c0_3, %c0_4] : memref<32x128xf32, #tpu.memory_space<vmem>>, vector<32x128xf32>
    tpu.vector_store %arg3[%c0_3, %c0_4], %2 {strides = array<i32>} : memref<32x128xf32, #tpu.memory_space<vmem>>, vector<32x128xf32>,
    return
  }
  func.func @transform_0(%arg0: i32) -> (i32, i32) {
    %c0_i32 = arith.constant 0 : i32
    %c0_i32_0 = arith.constant 0 : i32
    return %arg0, %c0_i32 : i32, i32
  }
  func.func @transform_1(%arg0: i32) -> (i32, i32) {
    %c0_i32 = arith.constant 0 : i32
    %c0_i32_0 = arith.constant 0 : i32
    return %arg0, %c0_i32 : i32, i32
  }
  func.func @transform_2(%arg0: i32) -> (i32, i32) {
    %c0_i32 = arith.constant 0 : i32
    %c0_i32_0 = arith.constant 0 : i32
    return %arg0, %c0_i32 : i32, i32
  }
}

</mosaic_0001>

<bundles_post_ra>
// kernel: positional_encoding_forward.1
= control target key start
LH: loop header
LB: loop body
LE: loop exit
PB: predicated region body
PF: predicated region fallthrough
CT: control target
= control target key end

     0   :  { %7 = vsyncpa [#allocation3], 0  ;;  %s77_s12 = smov [#allocation2]   ;;  %s78_s14 = smov 128   ;;  %s122_s0 = inlined_call_operand.vmem [shape: f32[26,128], index: 0, kind: input, shape index: {}]   ;;  %s123_s1 = inlined_call_operand.hbm [shape: f32[5000,128], index: 1, kind: input, shape index: {}]   ;;  %s124_s2 = inlined_call_operand.vmem [shape: f32[26,128], index: 2, kind: output, shape index: {}]  }
   0x1   :  { %s14_s11 = sshll.u32 %s123_s1, 4  ;;  %s16_s13 = sshll.u32 %s77_s12, 4  ;;  %s15_s11 = int_to_ptr.hbm [resolvable:$true] %s14_s11  ;;  %s17_s13 = int_to_ptr.vmem [resolvable:$true] %s16_s13 }
   0x2   :  { %s79_s15 = smov 8  }
   0x3   :  { %22 = dma.hbm_to_vmem [thread:$0]  %s15_s11, 512, %s17_s13, [#allocation3], %s78_s14, %s78_s14, %s79_s15  }
   0x4   :  { %75 = dma.done.wait [#allocation3], 512  }
   0x5   :  { %76 = vsyncadd [#allocation3], 4294966784  ;;  %v27_v0 = vld [vmem:[%s122_s0] sm:$0xff]  ;;  %v28_v2 = vld [vmem:[%s122_s0 + $0x8] sm:$0xff] }
   0x6   :  { %v31_v1 = vld [vmem:[#allocation2] sm:$0xff]  ;;  %v32_v4 = vld [vmem:[#allocation2 + $0x8] sm:$0xff]  ;;  %v29_v5 = vld [vmem:[%s122_s0 + $0x10] sm:$0xff] }
   0x7   :  { %v35_v3 = vadd.f32 %v31_v1, %v27_v0  ;;  %v33_v6 = vld [vmem:[#allocation2 + $0x10] sm:$0xff]  ;;  %v36_v7 = vadd.f32 %v32_v4, %v28_v2  ;;  %v30_v9 = vld [vmem:[%s122_s0 + $0x18] sm:$0xff] }
   0x8   :  { %v37_v8 = vadd.f32 %v33_v6, %v29_v5  ;;  %v34_v10 = vld [vmem:[#allocation2 + $0x18] sm:$0xff] }
   0x9   :  { %39 = vst [vmem:[%s124_s2] sm:$0xff] %v35_v3  ;;  %v38_v11 = vadd.f32 %v34_v10, %v30_v9 }
   0xa   :  { %40 = vst [vmem:[%s124_s2 + $0x8] sm:$0xff] %v36_v7 }
   0xb   :  { %41 = vst [vmem:[%s124_s2 + $0x10] sm:$0xff] %v37_v8 }
   0xc   :  { %42 = vst [vmem:[%s124_s2 + $0x18] sm:$0xff] %v38_v11 }
   0xd   :  { %47 = vsyncpa [#allocation3], 1 }

</bundles_post_ra>
